<compile_context>
chip_gen: v7x
topology: tpu7x:2x2x1
jax: 0.10.0
libtpu: 0.0.40
codegen_flags: <defaults>
</compile_context>

<pallas_src>
import functools

import jax
import jax.numpy as jnp
from jax.experimental import pallas as pl
from jax.experimental.pallas import tpu as pltpu

DROP_P = 0.3
D_IN, H1, H2, H3_PAD = 1024, 128, 64, 128  # layer-3 width padded 12 -> 128


def fcnn_kernel(x_ref, mask_ref,
                w1_ref, b1_ref, w2_ref, b2_ref,
                w3_ref, b3_ref, w4_ref, b4_ref,
                o_ref):
    # Layer 1: (TB,1024) @ (1024,128), bf16 inputs on the MXU, f32 accumulate.
    h1 = jnp.dot(x_ref[...], w1_ref[...], preferred_element_type=jnp.float32)
    h1 = jnp.maximum(h1 + b1_ref[...], 0.0)

    # Dropout(0.3), training-mode semantics: mask holds {0, 1/(1-p)}.
    h1 = h1 * mask_ref[...]

    # Layer 2: (TB,128) @ (128,64) + ReLU.
    h2 = jnp.dot(h1, w2_ref[...], preferred_element_type=jnp.float32)
    h2 = jnp.maximum(h2 + b2_ref[...], 0.0)

    # Layer 3: (TB,64) @ (64,128) + ReLU.  Columns 12..127 of w3/b3 are zero,
    # so ReLU keeps them at exactly 0 and they contribute nothing below.
    h3 = jnp.dot(h2, w3_ref[...], preferred_element_type=jnp.float32)
    h3 = jnp.maximum(h3 + b3_ref[...], 0.0)

    # Layer 4 (12 -> 1): VPU broadcast-multiply + lane reduction instead of an
    # N=1 MXU matmul.
    o_ref[...] = jnp.sum(h3 * w4_ref[...], axis=-1, keepdims=True) + b4_ref[...]


def _tile_and_pad(batch, max_tile):
    """Pick a batch tile (multiple of 8) and the padded batch size."""
    bp = -(-batch // 8) * 8
    tb = min(max_tile, bp)
    bp = -(-bp // tb) * tb
    return tb, bp


@functools.partial(jax.jit, static_argnames=("max_tile",))
def fcnn_forward(x, params, dropout_key, max_tile=512):
    w1, b1, w2, b2, w3p, b3p, w4row, b4 = params
    batch = x.shape[0]
    tb, bp = _tile_and_pad(batch, max_tile)

    # bf16 activations for the dominant matmul; also halves x HBM traffic.
    x_bf16 = x.astype(jnp.bfloat16)
    if bp != batch:
        x_bf16 = jnp.pad(x_bf16, ((0, bp - batch), (0, 0)))

    keep = jax.random.bernoulli(dropout_key, 1.0 - DROP_P, (bp, H1))
    mask = keep.astype(jnp.float32) * (1.0 / (1.0 - DROP_P))

    resident = lambda shape: pl.BlockSpec(shape, lambda i: (0,) * len(shape))

    flops = 2 * bp * (D_IN * H1 + H1 * H2 + H2 * H3_PAD + H3_PAD)
    bytes_accessed = (
        x_bf16.size * 2 + mask.size * 4 + bp * 4
        + sum(p.size * p.dtype.itemsize for p in params))

    out = pl.pallas_call(
        fcnn_kernel,
        out_shape=jax.ShapeDtypeStruct((bp, 1), jnp.float32),
        grid_spec=pltpu.PrefetchScalarGridSpec(
            num_scalar_prefetch=0,
            grid=(bp // tb,),
            in_specs=[
                pl.BlockSpec((tb, D_IN), lambda i: (i, 0)),   # x tile
                pl.BlockSpec((tb, H1), lambda i: (i, 0)),     # dropout mask tile
                resident(w1.shape), resident(b1.shape),
                resident(w2.shape), resident(b2.shape),
                resident(w3p.shape), resident(b3p.shape),
                resident(w4row.shape), resident(b4.shape),
            ],
            out_specs=pl.BlockSpec((tb, 1), lambda i: (i, 0)),
        ),
        compiler_params=pltpu.CompilerParams(
            dimension_semantics=("parallel",),      # megacore-shardable on v7x
            vmem_limit_bytes=32 * 1024 * 1024),     # safe on v5e/v6e/v7x
        cost_estimate=pl.CostEstimate(
            flops=flops, transcendentals=0, bytes_accessed=bytes_accessed),
    )(x_bf16, mask, *params)

    return out[:batch]


def init_params(key):
    """Deterministic synthetic params with nn.Linear-like fan-in scaling,
    pre-transposed to [in, out] and pre-padded for the kernel layout."""
    dims = [(1024, 128), (128, 64), (64, 12), (12, 1)]
    raw = []
    for fin, fout in dims:
        key, kw, kb = jax.random.split(key, 3)
        bound = 1.0 / (fin ** 0.5)
        w = jax.random.uniform(kw, (fin, fout), jnp.float32, -bound, bound)
        b = jax.random.uniform(kb, (fout,), jnp.float32, -bound, bound)
        raw.append((w, b))
    (w1, b1), (w2, b2), (w3, b3), (w4, b4) = raw

    # Lane-pad layer 3 (12 -> 128 outputs) and layer 4 weight row (12 -> 128).
    w3p = jnp.zeros((H2, H3_PAD), jnp.float32).at[:, :12].set(w3)
    b3p = jnp.zeros((1, H3_PAD), jnp.float32).at[:, :12].set(b3)
    w4row = jnp.zeros((1, H3_PAD), jnp.float32).at[:, :12].set(w4[:, 0])

    return (w1.astype(jnp.bfloat16), b1[None, :],
            w2, b2[None, :],
            w3p, b3p,
            w4row, jnp.reshape(b4, (1, 1)))


if __name__ == "__main__":
    key = jax.random.PRNGKey(0)
    kx, kp, kd = jax.random.split(key, 3)

    B = 8
    x = jax.random.normal(kx, (B, D_IN), dtype=jnp.float32)
    params = init_params(kp)

    out = fcnn_forward(x, params, kd)
    jax.block_until_ready(out)

    assert out.shape == (B, 1), out.shape
    assert out.dtype == jnp.float32, out.dtype
    assert bool(jnp.all(jnp.isfinite(out)))
    print("KERNEL_OK")
</pallas_src>

<mosaic_0001>
module attributes {stable_mosaic.version = 11 : i64} {
  func.func @fcnn_kernel(%arg0: i32, %arg1: memref<8x1024xbf16, #tpu.memory_space<vmem>>, %arg2: memref<8x128xf32, #tpu.memory_space<vmem>>, %arg3: memref<1024x128xbf16, #tpu.memory_space<vmem>>, %arg4: memref<1x128xf32, #tpu.memory_space<vmem>>, %arg5: memref<128x64xf32, #tpu.memory_space<vmem>>, %arg6: memref<1x64xf32, #tpu.memory_space<vmem>>, %arg7: memref<64x128xf32, #tpu.memory_space<vmem>>, %arg8: memref<1x128xf32, #tpu.memory_space<vmem>>, %arg9: memref<1x128xf32, #tpu.memory_space<vmem>>, %arg10: memref<1x1xf32, #tpu.memory_space<vmem>>, %arg11: memref<8x1xf32, #tpu.memory_space<vmem>>) attributes {dimension_semantics = [#tpu.dimension_semantics<parallel>], iteration_bounds = array<i64: 1>, scalar_prefetch = 0 : i64, scratch_operands = 0 : i64, tpu.core_type = #tpu.core_type<tc>, window_params = [{transform_indices = @transform_0, window_bounds = array<i64: 8, 1024>}, {transform_indices = @transform_1, window_bounds = array<i64: 8, 128>}, {pipeline_mode = #tpu.pipeline_mode<synchronous>, transform_indices = @transform_2, window_bounds = array<i64: 1024, 128>}, {pipeline_mode = #tpu.pipeline_mode<synchronous>, transform_indices = @transform_3, window_bounds = array<i64: 1, 128>}, {pipeline_mode = #tpu.pipeline_mode<synchronous>, transform_indices = @transform_4, window_bounds = array<i64: 128, 64>}, {pipeline_mode = #tpu.pipeline_mode<synchronous>, transform_indices = @transform_5, window_bounds = array<i64: 1, 64>}, {pipeline_mode = #tpu.pipeline_mode<synchronous>, transform_indices = @transform_6, window_bounds = array<i64: 64, 128>}, {pipeline_mode = #tpu.pipeline_mode<synchronous>, transform_indices = @transform_7, window_bounds = array<i64: 1, 128>}, {pipeline_mode = #tpu.pipeline_mode<synchronous>, transform_indices = @transform_8, window_bounds = array<i64: 1, 128>}, {pipeline_mode = #tpu.pipeline_mode<synchronous>, transform_indices = @transform_9, window_bounds = array<i64: 1, 1>}, {transform_indices = @transform_10, window_bounds = array<i64: 8, 1>}]} {
    %c0 = arith.constant 0 : index
    %c0_0 = arith.constant 0 : index
    %0 = vector.load %arg1[%c0, %c0_0] : memref<8x1024xbf16, #tpu.memory_space<vmem>>, vector<8x1024xbf16>
    %c0_1 = arith.constant 0 : index
    %c0_2 = arith.constant 0 : index
    %1 = vector.load %arg3[%c0_1, %c0_2] : memref<1024x128xbf16, #tpu.memory_space<vmem>>, vector<1024x128xbf16>
    %cst = arith.constant dense<0.000000e+00> : vector<8x128xf32>
    %2 = tpu.matmul %0, %1, %cst {dimension_numbers = #tpu.dot_dimension_numbers<[1], [0], [0], [1], [0, 0, 1, 1], [], []>} : vector<8x1024xbf16>, vector<1024x128xbf16>, vector<8x128xf32> -> vector<8x128xf32>
    %c0_3 = arith.constant 0 : index
    %c0_4 = arith.constant 0 : index
    %3 = vector.load %arg4[%c0_3, %c0_4] : memref<1x128xf32, #tpu.memory_space<vmem>>, vector<1x128xf32>
    %4 = vector.broadcast %3 : vector<1x128xf32> to vector<8x128xf32>
    %5 = arith.addf %2, %4 : vector<8x128xf32>
    %cst_5 = arith.constant 0.000000e+00 : f32
    %6 = vector.broadcast %cst_5 : f32 to vector<8x128xf32>
    %7 = arith.maximumf %5, %6 : vector<8x128xf32>
    %c0_6 = arith.constant 0 : index
    %c0_7 = arith.constant 0 : index
    %8 = vector.load %arg2[%c0_6, %c0_7] : memref<8x128xf32, #tpu.memory_space<vmem>>, vector<8x128xf32>
    %9 = arith.mulf %7, %8 : vector<8x128xf32>
    %c0_8 = arith.constant 0 : index
    %c0_9 = arith.constant 0 : index
    %10 = vector.load %arg5[%c0_8, %c0_9] : memref<128x64xf32, #tpu.memory_space<vmem>>, vector<128x64xf32>
    %cst_10 = arith.constant dense<0.000000e+00> : vector<8x64xf32>
    %11 = tpu.matmul %9, %10, %cst_10 {dimension_numbers = #tpu.dot_dimension_numbers<[1], [0], [0], [1], [0, 0, 1, 1], [], []>} : vector<8x128xf32>, vector<128x64xf32>, vector<8x64xf32> -> vector<8x64xf32>
    %c0_11 = arith.constant 0 : index
    %c0_12 = arith.constant 0 : index
    %12 = vector.load %arg6[%c0_11, %c0_12] : memref<1x64xf32, #tpu.memory_space<vmem>>, vector<1x64xf32>
    %13 = vector.broadcast %12 : vector<1x64xf32> to vector<8x64xf32>
    %14 = arith.addf %11, %13 : vector<8x64xf32>
    %cst_13 = arith.constant 0.000000e+00 : f32
    %15 = vector.broadcast %cst_13 : f32 to vector<8x64xf32>
    %16 = arith.maximumf %14, %15 : vector<8x64xf32>
    %c0_14 = arith.constant 0 : index
    %c0_15 = arith.constant 0 : index
    %17 = vector.load %arg7[%c0_14, %c0_15] : memref<64x128xf32, #tpu.memory_space<vmem>>, vector<64x128xf32>
    %cst_16 = arith.constant dense<0.000000e+00> : vector<8x128xf32>
    %18 = tpu.matmul %16, %17, %cst_16 {dimension_numbers = #tpu.dot_dimension_numbers<[1], [0], [0], [1], [0, 0, 1, 1], [], []>} : vector<8x64xf32>, vector<64x128xf32>, vector<8x128xf32> -> vector<8x128xf32>
    %c0_17 = arith.constant 0 : index
    %c0_18 = arith.constant 0 : index
    %19 = vector.load %arg8[%c0_17, %c0_18] : memref<1x128xf32, #tpu.memory_space<vmem>>, vector<1x128xf32>
    %20 = vector.broadcast %19 : vector<1x128xf32> to vector<8x128xf32>
    %21 = arith.addf %18, %20 : vector<8x128xf32>
    %cst_19 = arith.constant 0.000000e+00 : f32
    %22 = vector.broadcast %cst_19 : f32 to vector<8x128xf32>
    %23 = arith.maximumf %21, %22 : vector<8x128xf32>
    %c0_20 = arith.constant 0 : index
    %c0_21 = arith.constant 0 : index
    %24 = vector.load %arg9[%c0_20, %c0_21] : memref<1x128xf32, #tpu.memory_space<vmem>>, vector<1x128xf32>
    %25 = vector.broadcast %24 : vector<1x128xf32> to vector<8x128xf32>
    %26 = arith.mulf %23, %25 : vector<8x128xf32>
    %cst_22 = arith.constant dense<0.000000e+00> : vector<8xf32>
    %27 = vector.multi_reduction <add>, %26, %cst_22 [1] : vector<8x128xf32> to vector<8xf32>
    %28 = vector.shape_cast %27 : vector<8xf32> to vector<8x1xf32>
    %c0_23 = arith.constant 0 : index
    %c0_24 = arith.constant 0 : index
    %29 = vector.load %arg10[%c0_23, %c0_24] : memref<1x1xf32, #tpu.memory_space<vmem>>, vector<1x1xf32>
    %30 = vector.broadcast %29 : vector<1x1xf32> to vector<8x1xf32>
    %31 = arith.addf %28, %30 : vector<8x1xf32>
    %c0_25 = arith.constant 0 : index
    %c0_26 = arith.constant 0 : index
    %32 = vector.load %arg11[%c0_25, %c0_26] : memref<8x1xf32, #tpu.memory_space<vmem>>, vector<8x1xf32>
    tpu.vector_store %arg11[%c0_25, %c0_26], %31 {strides = array<i32>} : memref<8x1xf32, #tpu.memory_space<vmem>>, vector<8x1xf32>,
    return
  }
  func.func @transform_0(%arg0: i32) -> (i32, i32) {
    %c0_i32 = arith.constant 0 : i32
    %c0_i32_0 = arith.constant 0 : i32
    return %arg0, %c0_i32 : i32, i32
  }
  func.func @transform_1(%arg0: i32) -> (i32, i32) {
    %c0_i32 = arith.constant 0 : i32
    %c0_i32_0 = arith.constant 0 : i32
    return %arg0, %c0_i32 : i32, i32
  }
  func.func @transform_2(%arg0: i32) -> (i32, i32) {
    %c0_i32 = arith.constant 0 : i32
    %c0_i32_0 = arith.constant 0 : i32
    %c0_i32_1 = arith.constant 0 : i32
    return %c0_i32, %c0_i32_0 : i32, i32
  }
  func.func @transform_3(%arg0: i32) -> (i32, i32) {
    %c0_i32 = arith.constant 0 : i32
    %c0_i32_0 = arith.constant 0 : i32
    %c0_i32_1 = arith.constant 0 : i32
    return %c0_i32, %c0_i32_0 : i32, i32
  }
  func.func @transform_4(%arg0: i32) -> (i32, i32) {
    %c0_i32 = arith.constant 0 : i32
    %c0_i32_0 = arith.constant 0 : i32
    %c0_i32_1 = arith.constant 0 : i32
    return %c0_i32, %c0_i32_0 : i32, i32
  }
  func.func @transform_5(%arg0: i32) -> (i32, i32) {
    %c0_i32 = arith.constant 0 : i32
    %c0_i32_0 = arith.constant 0 : i32
    %c0_i32_1 = arith.constant 0 : i32
    return %c0_i32, %c0_i32_0 : i32, i32
  }
  func.func @transform_6(%arg0: i32) -> (i32, i32) {
    %c0_i32 = arith.constant 0 : i32
    %c0_i32_0 = arith.constant 0 : i32
    %c0_i32_1 = arith.constant 0 : i32
    return %c0_i32, %c0_i32_0 : i32, i32
  }
  func.func @transform_7(%arg0: i32) -> (i32, i32) {
    %c0_i32 = arith.constant 0 : i32
    %c0_i32_0 = arith.constant 0 : i32
    %c0_i32_1 = arith.constant 0 : i32
    return %c0_i32, %c0_i32_0 : i32, i32
  }
  func.func @transform_8(%arg0: i32) -> (i32, i32) {
    %c0_i32 = arith.constant 0 : i32
    %c0_i32_0 = arith.constant 0 : i32
    %c0_i32_1 = arith.constant 0 : i32
    return %c0_i32, %c0_i32_0 : i32, i32
  }
  func.func @transform_9(%arg0: i32) -> (i32, i32) {
    %c0_i32 = arith.constant 0 : i32
    %c0_i32_0 = arith.constant 0 : i32
    %c0_i32_1 = arith.constant 0 : i32
    return %c0_i32, %c0_i32_0 : i32, i32
  }
  func.func @transform_10(%arg0: i32) -> (i32, i32) {
    %c0_i32 = arith.constant 0 : i32
    %c0_i32_0 = arith.constant 0 : i32
    return %arg0, %c0_i32 : i32, i32
  }
}

</mosaic_0001>

<bundles_post_ra>
// kernel: fcnn_forward.1
= control target key start
LH: loop header
LB: loop body
LE: loop exit
PB: predicated region body
PF: predicated region fallthrough
CT: control target
= control target key end

     0   :  { %s1537_s0 = inlined_call_operand.vmem [shape: bf16[8,1024], index: 0, kind: input, shape index: {}]   ;;  %s1538_s1 = inlined_call_operand.vmem [shape: f32[8,128], index: 1, kind: input, shape index: {}]   ;;  %s1539_s2 = inlined_call_operand.hbm [shape: bf16[1024,128], index: 2, kind: input, shape index: {}]   ;;  %s1540_s3 = inlined_call_operand.vmem [shape: f32[1,128], index: 3, kind: input, shape index: {}]   ;;  %s1541_s4 = inlined_call_operand.vmem [shape: f32[128,64], index: 4, kind: input, shape index: {}]   ;;  %s1542_s5 = inlined_call_operand.vmem [shape: f32[1,64], index: 5, kind: input, shape index: {}]   ;;  %s1543_s6 = inlined_call_operand.vmem [shape: f32[64,128], index: 6, kind: input, shape index: {}]   ;;  %s1544_s7 = inlined_call_operand.vmem [shape: f32[1,128], index: 7, kind: input, shape index: {}]   ;;  %s1545_s8 = inlined_call_operand.vmem [shape: f32[1,128], index: 8, kind: input, shape index: {}]   ;;  %s1546_s9 = inlined_call_operand.<no memory space> [shape: f32[1,1], index: 9, kind: input, shape index: {}]   ;;  %s1547_s10 = inlined_call_operand.vmem [shape: f32[8,1], index: 10, kind: output, shape index: {}]  }
   0x1   :  { %v15_v0 = vstv %s1546_s9 }
   0x2   :  { %16 = vst [vmem:[#allocation2] sm:$0x1] %v15_v0 }
   0x3   :  { %17 = vsyncpa [#allocation4], 0  ;;  %s1359_s15 = smov [#allocation3]   ;;  %s1335_s19 = scalar_lea.hbm %s1539_s2, 8192 }
   0x4   :  { %s27_s16 = sshll.u32 %s1359_s15, 4  ;;  %p1336_p0 = scmp.ne.s32.totalorder %s1539_s2, %s1335_s19  ;;  %s28_s16 = int_to_ptr.vmem [resolvable:$true] %s27_s16 }
   0x5   :  { %p1339_p1 = scmp.lt.u32.totalorder %s1335_s19, %s1539_s2 }
   0x7   :  { %p1341_p2 = pnand %p1339_p1, %p1336_p0 }
   0x9   :  { %1344 = shalt.err (!%p1341_p2)
}
   0xa   :  { %s1345_s9 = scalar_lea.vmem %s28_s16, 8192  ;;  %p1350_p4 = scmp.lt.s32.totalorder %s28_s16, %s28_s16 }
   0xb   :  { %p1346_p3 = scmp.ne.s32.totalorder %s28_s16, %s1345_s9  ;;  %p1351_p5 = scmp.lt.s32.totalorder %s1345_s9, %s1345_s9 }
   0xd   :  { %p1352_p6 = por %p1351_p5, %p1350_p4 }
   0xf   :  { %p1353_p7 = pnand %p1352_p6, %p1346_p3 }
  0x11   :  { %1356 = shalt.err (!%p1353_p7)
}
  0x12   :  { %s1360_s24 = smov 64   ;;  %s1361_s25 = smov 4  }
  0x13   :  { %33 = dma.hbm_to_vmem [thread:$0]  %s1539_s2, 8192, %s28_s16, [#allocation4], %s1360_s24, %s1360_s24, %s1361_s25  }
  0x14   :  { %1357 = dma.done.wait [#allocation4], 8192  }
  0x15   :  { %1358 = vsyncadd [#allocation4], 4294959104  ;;  %v1263_v1 = vld [vmem:[#allocation3 + $0x40] sm:$0xff]   ;;  %v1267_v5 = vld [vmem:[#allocation3 + $0x48] sm:$0xff]   ;;  %vm1363_vm0 = vmmov 0   ;;  %vm875_vm1 = vcmask 523264  }
  0x16   :  { %v1264_v2 = vld [vmem:[#allocation3 + $0xc0] sm:$0xff]   ;;  %1053 = vmatprep.subr.bf16.mxu0 %v1263_v1  ;;  %v1268_v6 = vld [vmem:[#allocation3 + $0xc8] sm:$0xff]   ;;  %v1271_v9 = vld [vmem:[#allocation3 + $0x50] sm:$0xff]   ;;  %vm968_vm2 = vcmask 7168  }
  0x17   :  { %v1265_v3 = vld [vmem:[#allocation3] sm:$0xff]   ;;  %1075 = vmatprep.subr.bf16.mxu1 %v1264_v2  ;;  %v1269_v7 = vld [vmem:[#allocation3 + $0x8] sm:$0xff]   ;;  %v1272_v10 = vld [vmem:[#allocation3 + $0xd0] sm:$0xff]  }
  0x18   :  { %v1266_v4 = vld [vmem:[#allocation3 + $0x80] sm:$0xff]   ;;  %1054 = vmatpush3.bf16.msra.mxu0 %v1265_v3  ;;  %v1270_v8 = vld [vmem:[#allocation3 + $0x88] sm:$0xff]   ;;  %v1273_v11 = vld [vmem:[#allocation3 + $0x10] sm:$0xff]  }
  0x19   :  { %1076 = vmatpush3.bf16.msra.mxu1 %v1266_v4  ;;  %1055 = vmatprep.subr.bf16.mxu0 %v1267_v5  ;;  %v1274_v12 = vld [vmem:[#allocation3 + $0x90] sm:$0xff]   ;;  %v1275_v13 = vld [vmem:[#allocation3 + $0x58] sm:$0xff]   ;;  %v1279_v17 = vld [vmem:[#allocation3 + $0x60] sm:$0xff]  }
  0x1a   :  { %1077 = vmatprep.subr.bf16.mxu1 %v1268_v6  ;;  %v1276_v14 = vld [vmem:[#allocation3 + $0xd8] sm:$0xff]   ;;  %v1280_v18 = vld [vmem:[#allocation3 + $0xe0] sm:$0xff]   ;;  %v1283_v21 = vld [vmem:[#allocation3 + $0x68] sm:$0xff]  }
  0x1b   :  { %v1277_v15 = vld [vmem:[#allocation3 + $0x18] sm:$0xff]   ;;  %v1281_v19 = vld [vmem:[#allocation3 + $0x20] sm:$0xff]   ;;  %v1284_v22 = vld [vmem:[#allocation3 + $0xe8] sm:$0xff]  }
  0x1c   :  { %1056 = vmatpush3.bf16.msra.mxu0 %v1269_v7  ;;  %v1278_v16 = vld [vmem:[#allocation3 + $0x98] sm:$0xff]   ;;  %v1282_v20 = vld [vmem:[#allocation3 + $0xa0] sm:$0xff]   ;;  %v1285_v23 = vld [vmem:[#allocation3 + $0x28] sm:$0xff]  }
  0x1d   :  { %1078 = vmatpush3.bf16.msra.mxu1 %v1270_v8  ;;  %1057 = vmatprep.subr.bf16.mxu0 %v1271_v9  ;;  %v1286_v24 = vld [vmem:[#allocation3 + $0xa8] sm:$0xff]   ;;  %v1287_v25 = vld [vmem:[#allocation3 + $0x70] sm:$0xff]   ;;  %v1291_v29 = vld [vmem:[#allocation3 + $0x78] sm:$0xff]  }
  0x1e   :  { %1079 = vmatprep.subr.bf16.mxu1 %v1272_v10  ;;  %v1288_v26 = vld [vmem:[#allocation3 + $0xf0] sm:$0xff]   ;;  %v1292_v30 = vld [vmem:[#allocation3 + $0xf8] sm:$0xff]   ;;  %v53_v34 = vld [vmem:[%s1537_s0 + $0x8] sm:$0xff] }
  0x1f   :  { %v1289_v27 = vld [vmem:[#allocation3 + $0x30] sm:$0xff]   ;;  %v1293_v31 = vld [vmem:[#allocation3 + $0x38] sm:$0xff]   ;;  %v978_v37 = vcombine.low %v53_v34, %v53_v34  ;;  %v979_v38 = vcombine.high %v53_v34, %v53_v34  ;;  %v1299_v39 = vld [vmem:[#allocation3 + $0x140] sm:$0xff]  }
  0x20   :  { %1058 = vmatpush3.bf16.msra.mxu0 %v1273_v11  ;;  %v1290_v28 = vld [vmem:[#allocation3 + $0xb0] sm:$0xff]   ;;  %v1294_v32 = vld [vmem:[#allocation3 + $0xb8] sm:$0xff]   ;;  %v1300_v40 = vld [vmem:[#allocation3 + $0x1c0] sm:$0xff]  }
  0x21   :  { %1080 = vmatpush3.bf16.msra.mxu1 %v1274_v12  ;;  %1059 = vmatprep.subr.bf16.mxu0 %v1275_v13  ;;  %v52_v33 = vld [vmem:[%s1537_s0] sm:$0xff]  ;;  %v1303_v43 = vld [vmem:[#allocation3 + $0x148] sm:$0xff]   ;;  %v1307_v47 = vld [vmem:[#allocation3 + $0x150] sm:$0xff]  }
  0x22   :  { %1081 = vmatprep.subr.bf16.mxu1 %v1276_v14  ;;  %v976_v35 = vcombine.low %v52_v33, %v52_v33  ;;  %v977_v36 = vcombine.high %v52_v33, %v52_v33  ;;  %675 = vmatprep.mubr.bf16.mxu1 %v979_v38  ;;  %v1301_v41 = vld [vmem:[#allocation3 + $0x100] sm:$0xff]   ;;  %v1304_v44 = vld [vmem:[#allocation3 + $0x1c8] sm:$0xff]   ;;  %v1308_v48 = vld [vmem:[#allocation3 + $0x1d0] sm:$0xff]   ;;  %v1364_v38 = vmov 0.0  }
  0x23   :  { %v1302_v42 = vld [vmem:[#allocation3 + $0x180] sm:$0xff]   ;;  %v1305_v45 = vld [vmem:[#allocation3 + $0x108] sm:$0xff]   ;;  %v1309_v49 = vld [vmem:[#allocation3 + $0x110] sm:$0xff]  }
  0x24   :  { %1060 = vmatpush3.bf16.msra.mxu0 %v1277_v15  ;;  %635 = vmatprep.mubr.bf16.mxu0 %v977_v36  ;;  %v1306_v46 = vld [vmem:[#allocation3 + $0x188] sm:$0xff]   ;;  %v1310_v50 = vld [vmem:[#allocation3 + $0x190] sm:$0xff]   ;;  %v1311_v51 = vld [vmem:[#allocation3 + $0x158] sm:$0xff]  }
  0x25   :  { %1082 = vmatpush3.bf16.msra.mxu1 %v1278_v16  ;;  %1061 = vmatprep.subr.bf16.mxu0 %v1279_v17  ;;  %v1312_v52 = vld [vmem:[#allocation3 + $0x1d8] sm:$0xff]   ;;  %v1315_v55 = vld [vmem:[#allocation3 + $0x160] sm:$0xff]   ;;  %v1319_v59 = vld [vmem:[#allocation3 + $0x168] sm:$0xff]   ;;  %v1362_v16 = vmov 0.0|0.0  }
  0x26   :  { %1083 = vmatprep.subr.bf16.mxu1 %v1280_v18  ;;  %v1313_v53 = vld [vmem:[#allocation3 + $0x118] sm:$0xff]   ;;  %v1316_v56 = vld [vmem:[#allocation3 + $0x1e0] sm:$0xff]   ;;  %v1320_v60 = vld [vmem:[#allocation3 + $0x1e8] sm:$0xff]  }
  0x27   :  { %v1314_v54 = vld [vmem:[#allocation3 + $0x198] sm:$0xff]   ;;  %v1317_v57 = vld [vmem:[#allocation3 + $0x120] sm:$0xff]   ;;  %v1321_v61 = vld [vmem:[#allocation3 + $0x128] sm:$0xff]  }
  0x28   :  { %1062 = vmatpush3.bf16.msra.mxu0 %v1281_v19  ;;  %v1318_v58 = vld [vmem:[#allocation3 + $0x1a0] sm:$0xff]   ;;  %v1322_v62 = vld [vmem:[#allocation3 + $0x1a8] sm:$0xff]   ;;  %v1323_v63 = vld [vmem:[#allocation3 + $0x170] sm:$0xff]  }
  0x29   :  { %1084 = vmatpush3.bf16.msra.mxu1 %v1282_v20  ;;  %1063 = vmatprep.subr.bf16.mxu0 %v1283_v21  ;;  %v1324_v0 = vld [vmem:[#allocation3 + $0x1f0] sm:$0xff]   ;;  %v1327_v3 = vld [vmem:[#allocation3 + $0x178] sm:$0xff]   ;;  %v767_v14 = vld [vmem:[%s1541_s4 + $0x8] sm:$0xff] }
  0x2a   :  { %1085 = vmatprep.subr.bf16.mxu1 %v1284_v22  ;;  %v1325_v1 = vld [vmem:[#allocation3 + $0x130] sm:$0xff]   ;;  %v1328_v4 = vld [vmem:[#allocation3 + $0x1f8] sm:$0xff]   ;;  %v771_v21 = vld [vmem:[%s1541_s4 + $0x28] sm:$0xff] }
  0x2b   :  { %v1326_v2 = vld [vmem:[#allocation3 + $0x1b0] sm:$0xff]   ;;  %v1329_v5 = vld [vmem:[#allocation3 + $0x138] sm:$0xff]   ;;  %v779_v33 = vld [vmem:[%s1541_s4 + $0x68] sm:$0xff] }
  0x2c   :  { %1064 = vmatpush3.bf16.msra.mxu0 %v1285_v23  ;;  %v1330_v6 = vld [vmem:[#allocation3 + $0x1b8] sm:$0xff]   ;;  %v54_v7 = vld [vmem:[%s1537_s0 + $0x10] sm:$0xff] }
  0x2d   :  { %1086 = vmatpush3.bf16.msra.mxu1 %v1286_v24  ;;  %1065 = vmatprep.subr.bf16.mxu0 %v1287_v25  ;;  %v980_v8 = vcombine.low %v54_v7, %v54_v7  ;;  %v981_v9 = vcombine.high %v54_v7, %v54_v7  ;;  %v55_v10 = vld [vmem:[%s1537_s0 + $0x18] sm:$0xff]  ;;  %v766_v13 = vld [vmem:[%s1541_s4] sm:$0xff]  ;;  %v768_v15 = vld [vmem:[%s1541_s4 + $0x10] sm:$0xff] }
  0x2e   :  { %1087 = vmatprep.subr.bf16.mxu1 %v1288_v26  ;;  %v982_v11 = vcombine.low %v55_v10, %v55_v10  ;;  %v983_v12 = vcombine.high %v55_v10, %v55_v10  ;;  %v1222_v17 = vpack.c.bf16 %v767_v14, %v766_v13  ;;  %v769_v18 = vld [vmem:[%s1541_s4 + $0x18] sm:$0xff]  ;;  %v770_v20 = vld [vmem:[%s1541_s4 + $0x20] sm:$0xff]  ;;  %v772_v23 = vld [vmem:[%s1541_s4 + $0x30] sm:$0xff] }
  0x2f   :  { %v1225_v19 = vpack.c.bf16 %v769_v18, %v768_v15  ;;  %v1228_v22 = vpack.c.bf16 %v771_v21, %v770_v20  ;;  %v773_v24 = vld [vmem:[%s1541_s4 + $0x38] sm:$0xff]  ;;  %v774_v26 = vld [vmem:[%s1541_s4 + $0x40] sm:$0xff] }
  0x30   :  { %1066 = vmatpush3.bf16.msra.mxu0 %v1289_v27  ;;  %v1231_v25 = vpack.c.bf16 %v773_v24, %v772_v23  ;;  %v775_v27 = vld [vmem:[%s1541_s4 + $0x48] sm:$0xff]  ;;  %v781_v36 = vld [vmem:[%s1541_s4 + $0x78] sm:$0xff]  ;;  %v1048_v15 = vld [vmem:[%s1542_s5] ss:$0 sm:$0xff] }
  0x31   :  { %1088 = vmatpush3.bf16.msra.mxu1 %v1290_v28  ;;  %1067 = vmatprep.subr.bf16.mxu0 %v1291_v29  ;;  %v1234_v28 = vpack.c.bf16 %v775_v27, %v774_v26  ;;  %v776_v29 = vld [vmem:[%s1541_s4 + $0x50] sm:$0xff]  ;;  %v867_v13 = vld [vmem:[%s1543_s6 + $0x38] sm:$0xff]  ;;  %v1049_v20 = vld [vmem:[%s1544_s7] ss:$0 sm:$0xff] }
  0x32   :  { %1089 = vmatprep.subr.bf16.mxu1 %v1292_v30  ;;  %v777_v30 = vld [vmem:[%s1541_s4 + $0x58] sm:$0xff]  ;;  %v1051_v24 = vld [vmem:[%s1545_s8] ss:$0 sm:$0xff] }
  0x33   :  { %v1052_v27 = vld [vmem:[#allocation2] ss:$0 sm:$0xff] }
  0x34   :  { %1068 = vmatpush3.bf16.msra.mxu0 %v1293_v31  ;;  %v1237_v31 = vpack.c.bf16 %v777_v30, %v776_v29 }
  0x35   :  { %1090 = vmatpush3.bf16.msra.mxu1 %v1294_v32  ;;  %1097 = vmatprep.subr.bf16.mxu0 %v1299_v39  ;;  %v778_v32 = vld [vmem:[%s1541_s4 + $0x60] sm:$0xff] }
  0x36   :  { %1119 = vmatprep.subr.bf16.mxu1 %v1300_v40  ;;  %v1240_v34 = vpack.c.bf16 %v779_v33, %v778_v32  ;;  %v860_v39 = vld [vmem:[%s1543_s6] sm:$0xff]  ;;  %v861_v40 = vld [vmem:[%s1543_s6 + $0x8] sm:$0xff] }
  0x37   :  { %636 = vmatmul.mubr.bf16.vlgmr.msra.gmra.mrb[0].mxu0 %v976_v35  ;;  %v780_v35 = vld [vmem:[%s1541_s4 + $0x70] sm:$0xff] }
  0x38   :  { %676 = vmatmul.mubr.bf16.vlgmr.msra.gmra.mrb[0].mxu1 %v978_v37  ;;  %1098 = vmatpush3.bf16.msra.mxu0 %v1301_v41  ;;  %v1243_v37 = vpack.c.bf16 %v781_v36, %v780_v35  ;;  %v862_v41 = vld [vmem:[%s1543_s6 + $0x10] sm:$0xff] }
  0x39   :  { %1120 = vmatpush3.bf16.msra.mxu1 %v1302_v42  ;;  %1099 = vmatprep.subr.bf16.mxu0 %v1303_v43  ;;  %v1246_v42 = vpack.c.bf16 %v861_v40, %v860_v39  ;;  %v863_v43 = vld [vmem:[%s1543_s6 + $0x18] sm:$0xff] }
  0x3a   :  { %1121 = vmatprep.subr.bf16.mxu1 %v1304_v44  ;;  %715 = vmatprep.mubr.bf16.mxu0 %v981_v9  ;;  %v1249_v44 = vpack.c.bf16 %v863_v43, %v862_v41  ;;  %v764_v9 = vld [vmem:[%s1538_s1] sm:$0xff] }
  0x3b   :  { %755 = vmatprep.mubr.bf16.mxu1 %v983_v12  ;;  %v866_v12 = vld [vmem:[%s1543_s6 + $0x30] sm:$0xff] }
  0x3c   :  { %1100 = vmatpush3.bf16.msra.mxu0 %v1305_v45  ;;  %v864_v45 = vld [vmem:[%s1543_s6 + $0x20] sm:$0xff]  ;;  %v1255_v14 = vpack.c.bf16 %v867_v13, %v866_v12 }
  0x3d   :  { %1122 = vmatpush3.bf16.msra.mxu1 %v1306_v46  ;;  %1101 = vmatprep.subr.bf16.mxu0 %v1307_v47  ;;  %v865_v46 = vld [vmem:[%s1543_s6 + $0x28] sm:$0xff] }
  0x3e   :  { %1123 = vmatprep.subr.bf16.mxu1 %v1308_v48  ;;  %v1252_v47 = vpack.c.bf16 %v865_v46, %v864_v45 }
  0x40   :  { %1102 = vmatpush3.bf16.msra.mxu0 %v1309_v49 }
  0x41   :  { %1124 = vmatpush3.bf16.msra.mxu1 %v1310_v50  ;;  %1103 = vmatprep.subr.bf16.mxu0 %v1311_v51  ;;  %v975_v50 = vld [vmem:[%s1540_s3] ss:$0 sm:$0xff] }
  0x42   :  { %1125 = vmatprep.subr.bf16.mxu1 %v1312_v52 }
  0x44   :  { %1104 = vmatpush3.bf16.msra.mxu0 %v1313_v53 }
  0x45   :  { %1126 = vmatpush3.bf16.msra.mxu1 %v1314_v54  ;;  %1105 = vmatprep.subr.bf16.mxu0 %v1315_v55 }
  0x46   :  { %1127 = vmatprep.subr.bf16.mxu1 %v1316_v56 }
  0x48   :  { %1106 = vmatpush3.bf16.msra.mxu0 %v1317_v57 }
  0x49   :  { %1128 = vmatpush3.bf16.msra.mxu1 %v1318_v58  ;;  %1107 = vmatprep.subr.bf16.mxu0 %v1319_v59 }
  0x4a   :  { %1129 = vmatprep.subr.bf16.mxu1 %v1320_v60 }
  0x4c   :  { %1108 = vmatpush3.bf16.msra.mxu0 %v1321_v61 }
  0x4d   :  { %1130 = vmatpush3.bf16.msra.mxu1 %v1322_v62  ;;  %1109 = vmatprep.subr.bf16.mxu0 %v1323_v63 }
  0x4e   :  { %1131 = vmatprep.subr.bf16.mxu1 %v1324_v0 }
  0x50   :  { %1110 = vmatpush3.bf16.msra.mxu0 %v1325_v1 }
  0x51   :  { %1132 = vmatpush3.bf16.msra.mxu1 %v1326_v2  ;;  %1111 = vmatprep.subr.bf16.mxu0 %v1327_v3 }
  0x52   :  { %1133 = vmatprep.subr.bf16.mxu1 %v1328_v4 }
  0x54   :  { %1112 = vmatpush3.bf16.msra.mxu0 %v1329_v5 }
  0x55   :  { %1134 = vmatpush3.bf16.msra.mxu1 %v1330_v6  ;;  %1221 = vmatprep.subr.bf16.mxu0 %v1362_v16 }
  0x56   :  { %1245 = vmatprep.subr.bf16.mxu1 %v1362_v16 }
  0x57   :  { %716 = vmatmul.mubr.bf16.vlgmr.msra.gmra.mrb[4].mxu0 %v980_v8 }
  0x58   :  { %756 = vmatmul.mubr.bf16.vlgmr.msra.gmra.mrb[4].mxu1 %v982_v11  ;;  %1223 = vmatpush3.bf16.msra.mxu0 %v1222_v17 }
  0x59   :  { %1224 = vmatprep.subr.bf16.mxu0 %v1362_v16  ;;  %1199 = vmatprep.mubr.msk.f32.mxu0 %vm1363_vm0, %v1364_v38 }
  0x5a   :  { %1218 = vmatprep.mubr.msk.f32.mxu1 %vm1363_vm0, %v1364_v38  ;;  %1247 = vmatpush3.bf16.msra.mxu1 %v1246_v42 }
  0x5b   :  { %1248 = vmatprep.subr.bf16.mxu1 %v1362_v16 }
  0x5c   :  { %1226 = vmatpush3.bf16.msra.mxu0 %v1225_v19 }
  0x5d   :  { %1227 = vmatprep.subr.bf16.mxu0 %v1362_v16 }
  0x5e   :  { %1250 = vmatpush3.bf16.msra.mxu1 %v1249_v44 }
  0x5f   :  { %1251 = vmatprep.subr.bf16.mxu1 %v1362_v16 }
  0x60   :  { %1229 = vmatpush3.bf16.msra.mxu0 %v1228_v22 }
  0x61   :  { %1230 = vmatprep.subr.bf16.mxu0 %v1362_v16 }
  0x62   :  { %1253 = vmatpush3.bf16.msra.mxu1 %v1252_v47 }
  0x63   :  { %1254 = vmatprep.subr.bf16.mxu1 %v1362_v16 }
  0x64   :  { %1232 = vmatpush3.bf16.msra.mxu0 %v1231_v25 }
  0x65   :  { %1233 = vmatprep.subr.bf16.mxu0 %v1362_v16 }
  0x66   :  { %1256 = vmatpush3.bf16.msra.mxu1 %v1255_v14 }
  0x68   :  { %1235 = vmatpush3.bf16.msra.mxu0 %v1234_v28 }
  0x69   :  { %1236 = vmatprep.subr.bf16.mxu0 %v1362_v16 }
  0x6c   :  { %1238 = vmatpush3.bf16.msra.mxu0 %v1237_v31 }
  0x6d   :  { %1239 = vmatprep.subr.bf16.mxu0 %v1362_v16 }
  0x70   :  { %1241 = vmatpush3.bf16.msra.mxu0 %v1240_v34 }
  0x71   :  { %1242 = vmatprep.subr.bf16.mxu0 %v1362_v16 }
  0x74   :  { %1244 = vmatpush3.bf16.msra.mxu0 %v1243_v37 }
 0x10a   :  { %v1069_v48 = vpop.f32.mrb[0].mxu0 }
 0x10b   :  { %v1091_v49 = vpop.f32.mrb[0].mxu1  ;;  %v1070_v51 = vpop.f32.mrb[1].mxu0 }
 0x10c   :  { %v1092_v52 = vpop.f32.mrb[1].mxu1  ;;  %v1071_v53 = vadd.f32 %v1070_v51, %v1069_v48  ;;  %v1072_v55 = vpop.f32.mrb[2].mxu0 }
 0x10d   :  { %v1093_v54 = vadd.f32 %v1092_v52, %v1091_v49  ;;  %v1094_v56 = vpop.f32.mrb[2].mxu1  ;;  %v1073_v57 = vpop.f32.mrb[3].mxu0 }
 0x10e   :  { %v1095_v58 = vpop.f32.mrb[3].mxu1  ;;  %v638_v59 = vadd.f32 %v1071_v53, %v975_v50 }
 0x110   :  { %v678_v60 = vadd.f32 %v1093_v54, %v638_v59 }
 0x12a   :  { %v1113_v61 = vpop.f32.mrb[4].mxu0 }
 0x12b   :  { %v1135_v62 = vpop.f32.mrb[4].mxu1  ;;  %v1114_v63 = vpop.f32.mrb[5].mxu0 }
 0x12c   :  { %v1136_v0 = vpop.f32.mrb[5].mxu1  ;;  %v1115_v1 = vadd.f32 %v1114_v63, %v1113_v61  ;;  %v1116_v3 = vpop.f32.mrb[6].mxu0 }
 0x12d   :  { %v1137_v2 = vadd.f32 %v1136_v0, %v1135_v62  ;;  %v1138_v4 = vpop.f32.mrb[6].mxu1  ;;  %v1117_v5 = vpop.f32.mrb[7].mxu0 }
 0x12e   :  { %v1139_v6 = vpop.f32.mrb[7].mxu1  ;;  %v718_v7 = vadd.f32 %v1115_v1, %v678_v60 }
 0x130   :  { %v758_v8 = vadd.f32 %v1137_v2, %v718_v7 }
 0x132   :  { %v763_v10 = vmax.f32 %v758_v8, 0.0 }
 0x134   :  { %v765_v11 = vmul.f32 %v764_v9, %v763_v10 }
 0x136   :  { %1200 = vmatmul.mubr.f32.vlgmr.msra.gmra.mrb[8].mxu0 %v765_v11 }
 0x209   :  { %v855_v16 = vpop.f32.mrb[8].mxu0 }
 0x20a   :  { %v856_v17 = vadd.f32 %v1048_v15, %v855_v16  ;;  %v1201_v18 = vpop.f32.mrb[9].mxu0 }
 0x20c   :  { %v859_v19 = vmax.f32 %v856_v17, 0.0 }
 0x20e   :  { %1219 = vmatmul.mubr.msk.f32.vlgmr.msra.gmra.mrb[8].mxu1 %vm875_vm1, %v859_v19 }
 0x2e1   :  { %v945_v21 = vpop.f32.mrb[8].mxu1 }
 0x2e2   :  { %v946_v22 = vadd.f32 %v1049_v20, %v945_v21  ;;  %v1220_v23 = vpop.f32.mrb[9].mxu1 }
 0x2e4   :  { %v949_v25 = vmax.f32 %v946_v22, 0.0 }
 0x2e6   :  { %v957_v26 = vmul.f32 %v1051_v24, %v949_v25 }
 0x2e8   :  { %958 = vadd.xlane.f32.xlu0 %v957_v26 }
 0x375   :  { %v959_v28 = vpop.xlane.xlu0 %958 }
 0x376   :  { %v967_v29 = vadd.f32 %v1052_v27, %v959_v28 }
 0x378   :  { %969 = vst.msk [vmem:[%s1547_s10] sm:$0xff] %vm968_vm2, %v967_v29 }
 0x379   :  { %974 = vsyncpa [#allocation4], 1 }

</bundles_post_ra>
